<compile_context>
chip_gen: v5e
topology: v5e:2x2
jax: 0.10.0
libtpu: 0.0.40
codegen_flags: <defaults>
</compile_context>

<pallas_src>
import math
import functools

import jax
import jax.numpy as jnp
from jax import lax
from jax.experimental import pallas as pl
from jax.experimental.pallas import tpu as pltpu


# --------------------------------------------------------------------------
# Fused SNAIL kernel: one grid step == one batch element, all blocks fused.
# The output block doubles as the channel-slab scratch (channels-major).
# --------------------------------------------------------------------------
def _snail_fused_kernel(plan, x_ref, *refs):
    n_p = 2 * len(plan)
    params = refs[:n_p]
    out_ref = refs[n_p]                               # (1, C_out, T), f32

    c_in = x_ref.shape[1]
    T = x_ref.shape[2]

    # Copy the input once into the first C_in channel rows of the slab.
    out_ref[0, :c_in, :] = x_ref[0].astype(jnp.float32)

    # Hoisted causal mask (built once, only needed by attention blocks).
    if any(blk['type'] == 'attention' for blk in plan):
        row = lax.broadcasted_iota(jnp.int32, (T, T), 0)   # query time
        col = lax.broadcasted_iota(jnp.int32, (T, T), 1)   # key time
        causal = col <= row                                # self-inclusive

    pi = 0
    for blk in plan:
        off = blk['in_size']                           # prefix channel count
        # Prefix rows of the slab are this block's input; matmul runs in bf16.
        h = out_ref[0, :off, :].astype(jnp.bfloat16)   # (off, T)

        if blk['type'] == 'dense':
            F = blk['filters']
            d = blk['dilation']
            w = params[pi][...]                        # (4F, off) bf16
            b = params[pi + 1][...]                    # (2F, 1)  f32
            pi += 2
            # One wide MXU matmul for all four conv taps (f/g x {x[t], x[t-d]}).
            y = jnp.dot(w, h, preferred_element_type=jnp.float32)   # (4F, T)
            cur = y[:2 * F, :]                         # contribution of x[t]
            prev = y[2 * F:, :]                        # contribution of x[t-d]
            # Causal dilated shift = pure data movement along time (lane axis);
            # the leading zeros reproduce the causal zero-padding exactly.
            if d < T:
                prev = jnp.concatenate(
                    [jnp.zeros((2 * F, d), jnp.float32), prev[:, :T - d]],
                    axis=1)
            else:
                prev = jnp.zeros((2 * F, T), jnp.float32)
            yy = cur + prev + b
            act = jnp.tanh(yy[:F, :]) * jax.nn.sigmoid(yy[F:, :])
            out_ref[0, off:off + F, :] = act           # write only new rows

        else:  # attention
            K = blk['key_size']
            V = blk['value_size']
            w = params[pi][...]                        # (2K+V, off) bf16
            b = params[pi + 1][...]                    # (2K+V, 1)  f32
            pi += 2
            qkv = jnp.dot(w, h, preferred_element_type=jnp.float32) + b
            q = qkv[:K, :]                             # (K, T)
            k = qkv[K:2 * K, :]                        # (K, T)
            v = qkv[2 * K:, :]                         # (V, T)
            qT = jnp.transpose(q, (1, 0)).astype(jnp.bfloat16)       # (T, K)
            logits = jnp.dot(qT, k.astype(jnp.bfloat16),
                             preferred_element_type=jnp.float32)     # (T, T)
            logits = logits * (1.0 / math.sqrt(K))
            logits = jnp.where(causal, logits, jnp.float32(-1e30))
            logits = logits - jnp.max(logits, axis=-1, keepdims=True)
            p = jnp.exp(logits)
            denom = jnp.sum(p, axis=-1, keepdims=True)
            p = p * pl.reciprocal(denom, approx=False)      # EUP slot, exact
            # attended[c, i] = sum_j v[c, j] * p[i, j]  -> (V, T)
            att = lax.dot_general(
                v.astype(jnp.bfloat16), p.astype(jnp.bfloat16),
                dimension_numbers=(((1,), (1,)), ((), ())),
                preferred_element_type=jnp.float32)
            out_ref[0, off:off + V, :] = att
            # TODO(synk): flash-style (tq, tk) online-softmax tiling for long
            # seq_length (the (T,T) logits are materialized in VMEM here).


# --------------------------------------------------------------------------
# Parameter initialization (deterministic, PyTorch-style uniform bounds);
# weights are pre-fused and pre-transposed (rows = output channels) at init
# and stored in bf16 for full MXU rate; biases stay f32.
# --------------------------------------------------------------------------
def _uniform(key, shape, bound):
    return jax.random.uniform(key, shape, jnp.float32, -bound, bound)


def init_snail(key, input_size, seq_length, architecture):
    plan = []
    flat = []
    size = input_size
    for info in architecture:
        if info['module_type'] == 'TC':
            filters = info['module_kwargs']['filters']
            n_layers = int(math.ceil(math.log2(seq_length)))
            for i in range(n_layers):
                key, *ks = jax.random.split(key, 7)
                bound = 1.0 / math.sqrt(size * 2)   # Conv1d fan_in = C * ksize
                wf_cur = _uniform(ks[0], (filters, size), bound)
                wg_cur = _uniform(ks[1], (filters, size), bound)
                wf_prev = _uniform(ks[2], (filters, size), bound)
                wg_prev = _uniform(ks[3], (filters, size), bound)
                bf = _uniform(ks[4], (filters,), bound)
                bg = _uniform(ks[5], (filters,), bound)
                w_all = jnp.concatenate(
                    [wf_cur, wg_cur, wf_prev, wg_prev], axis=0
                ).astype(jnp.bfloat16)                               # (4F, C)
                b_all = jnp.concatenate([bf, bg]).reshape(2 * filters, 1)
                plan.append(dict(type='dense', in_size=size,
                                 dilation=2 ** i, filters=filters))
                flat += [w_all, b_all]
                size += filters
        elif info['module_type'] == 'ATTENTION':
            K = info['module_kwargs']['key_size']
            V = info['module_kwargs']['value_size']
            key, *ks = jax.random.split(key, 7)
            bound = 1.0 / math.sqrt(size)           # Linear fan_in = C
            wq = _uniform(ks[0], (K, size), bound)
            wk = _uniform(ks[1], (K, size), bound)
            wv = _uniform(ks[2], (V, size), bound)
            bq = _uniform(ks[3], (K,), bound)
            bk = _uniform(ks[4], (K,), bound)
            bv = _uniform(ks[5], (V,), bound)
            w_all = jnp.concatenate([wq, wk, wv], axis=0).astype(jnp.bfloat16)
            b_all = jnp.concatenate([bq, bk, bv]).reshape(2 * K + V, 1)
            plan.append(dict(type='attention', in_size=size,
                             key_size=K, value_size=V))
            flat += [w_all, b_all]
            size += V
        else:
            raise ValueError(info['module_type'])
    return dict(plan=plan, flat=flat, output_size=size)


# --------------------------------------------------------------------------
# Snail forward (mirrors Snail.forward dim handling; InferenceMode.NONE).
# No wrapper transposes / slices: kernel ingests (B, C, T) and emits
# (B, C_out, T) directly.
# --------------------------------------------------------------------------
def snail_forward(params, x, frame_no=0):
    shape_len = x.ndim
    assert shape_len in (2, 3), 'Invalid number of dimensions, should be in [2,3]'
    if shape_len == 2:
        x = x[None]                                   # (1, C, T)
    B, C, T = x.shape

    plan = params['plan']
    flat = params['flat']
    c_out = params['output_size']

    def _full_spec(shape):
        nd = len(shape)
        return pl.BlockSpec(shape, lambda b, _nd=nd: (0,) * _nd)

    in_specs = [pl.BlockSpec((1, C, T), lambda b: (b, 0, 0))]
    in_specs += [_full_spec(a.shape) for a in flat]   # weights resident across grid
    # TODO(synk): pipeline_mode=pl.Buffered(1) on the grid-invariant weight
    # specs would halve their VMEM (headroom on v7x's 64 MiB).
    # TODO(synk): for tiny T, pack several batch elements per grid step
    # (block-diagonal causal mask) to raise MXU M-occupancy.

    kern = functools.partial(_snail_fused_kernel, plan)
    out = pl.pallas_call(
        kern,
        out_shape=jax.ShapeDtypeStruct((B, c_out, T), jnp.float32),
        grid=(B,),
        in_specs=in_specs,
        out_specs=pl.BlockSpec((1, c_out, T), lambda b: (b, 0, 0)),
        compiler_params=pltpu.CompilerParams(
            dimension_semantics=("parallel",),        # batch across cores (v7x)
            vmem_limit_bytes=64 * 1024 * 1024),
    )(x.astype(jnp.float32), *flat)

    if shape_len == 2:
        out = out[0]
    return out


# --------------------------------------------------------------------------
# Pure-JAX reference mirroring the kernel math exactly (same bf16 casts,
# same fused weights) -> tight tolerance in the correctness check.
# --------------------------------------------------------------------------
def _snail_ref_single(plan, flat, x_ct):
    C, T = x_ct.shape
    h = x_ct.astype(jnp.float32)                      # (C, T), grows on axis 0
    pi = 0
    for blk in plan:
        hb = h.astype(jnp.bfloat16)
        if blk['type'] == 'dense':
            F = blk['filters']; d = blk['dilation']
            w = flat[pi]; b = flat[pi + 1]; pi += 2
            y = jnp.dot(w, hb, preferred_element_type=jnp.float32)
            cur, prev = y[:2 * F, :], y[2 * F:, :]
            if d < T:
                prev = jnp.concatenate(
                    [jnp.zeros((2 * F, d), jnp.float32), prev[:, :T - d]], axis=1)
            else:
                prev = jnp.zeros((2 * F, T), jnp.float32)
            yy = cur + prev + b
            act = jnp.tanh(yy[:F, :]) * jax.nn.sigmoid(yy[F:, :])
            h = jnp.concatenate([h, act], axis=0)
        else:
            K = blk['key_size']; V = blk['value_size']
            w = flat[pi]; b = flat[pi + 1]; pi += 2
            qkv = jnp.dot(w, hb, preferred_element_type=jnp.float32) + b
            q, k, v = qkv[:K, :], qkv[K:2 * K, :], qkv[2 * K:, :]
            qT = jnp.transpose(q, (1, 0)).astype(jnp.bfloat16)
            logits = jnp.dot(qT, k.astype(jnp.bfloat16),
                             preferred_element_type=jnp.float32) * (1.0 / math.sqrt(K))
            row = jnp.arange(T)[:, None]; col = jnp.arange(T)[None, :]
            logits = jnp.where(col <= row, logits, jnp.float32(-1e30))
            logits = logits - jnp.max(logits, axis=-1, keepdims=True)
            p = jnp.exp(logits)
            p = p / jnp.sum(p, axis=-1, keepdims=True)
            att = lax.dot_general(
                v.astype(jnp.bfloat16), p.astype(jnp.bfloat16),
                dimension_numbers=(((1,), (1,)), ((), ())),
                preferred_element_type=jnp.float32)
            h = jnp.concatenate([h, att], axis=0)
    return h


def snail_forward_ref(params, x):
    if x.ndim == 2:
        x = x[None]
    fn = functools.partial(_snail_ref_single, params['plan'], params['flat'])
    return jax.vmap(fn)(x.astype(jnp.float32))


# --------------------------------------------------------------------------
if __name__ == "__main__":
    key = jax.random.PRNGKey(0)
    B, input_size, seq_length = 2, 32, 8

    architecture = [
        {'module_type': 'TC', 'module_kwargs': {'filters': 16}},
        {'module_type': 'ATTENTION',
         'module_kwargs': {'key_size': 16, 'value_size': 16}},
    ]

    k_param, k_x = jax.random.split(key)
    params = init_snail(k_param, input_size, seq_length, architecture)

    # external layout (B, C, T), as the PyTorch Conv1d-based blocks expect
    x = jax.random.normal(k_x, (B, input_size, seq_length), jnp.float32)
    frame_no = seq_length

    out = jax.block_until_ready(snail_forward(params, x, frame_no))
    ref = jax.block_until_ready(snail_forward_ref(params, x))

    expected_c = params['output_size']  # 32 + 3*16 + 16 = 96
    assert out.shape == (B, expected_c, seq_length), out.shape
    err = float(jnp.max(jnp.abs(out - ref)))
    assert err < 1e-2, err

    print("KERNEL_OK")
</pallas_src>

<mosaic_0001>
module attributes {stable_mosaic.version = 11 : i64} {
  func.func @_snail_fused_kernel(%arg0: i32, %arg1: memref<1x32x8xf32, #tpu.memory_space<vmem>>, %arg2: memref<64x32xbf16, #tpu.memory_space<vmem>>, %arg3: memref<32x1xf32, #tpu.memory_space<vmem>>, %arg4: memref<64x48xbf16, #tpu.memory_space<vmem>>, %arg5: memref<32x1xf32, #tpu.memory_space<vmem>>, %arg6: memref<64x64xbf16, #tpu.memory_space<vmem>>, %arg7: memref<32x1xf32, #tpu.memory_space<vmem>>, %arg8: memref<48x80xbf16, #tpu.memory_space<vmem>>, %arg9: memref<48x1xf32, #tpu.memory_space<vmem>>, %arg10: memref<1x96x8xf32, #tpu.memory_space<vmem>>) attributes {dimension_semantics = [#tpu.dimension_semantics<parallel>], iteration_bounds = array<i64: 2>, scalar_prefetch = 0 : i64, scratch_operands = 0 : i64, tpu.core_type = #tpu.core_type<tc>, window_params = [{transform_indices = @transform_0, window_bounds = array<i64: 1, 32, 8>}, {pipeline_mode = #tpu.pipeline_mode<synchronous>, transform_indices = @transform_1, window_bounds = array<i64: 64, 32>}, {pipeline_mode = #tpu.pipeline_mode<synchronous>, transform_indices = @transform_2, window_bounds = array<i64: 32, 1>}, {pipeline_mode = #tpu.pipeline_mode<synchronous>, transform_indices = @transform_3, window_bounds = array<i64: 64, 48>}, {pipeline_mode = #tpu.pipeline_mode<synchronous>, transform_indices = @transform_4, window_bounds = array<i64: 32, 1>}, {pipeline_mode = #tpu.pipeline_mode<synchronous>, transform_indices = @transform_5, window_bounds = array<i64: 64, 64>}, {pipeline_mode = #tpu.pipeline_mode<synchronous>, transform_indices = @transform_6, window_bounds = array<i64: 32, 1>}, {pipeline_mode = #tpu.pipeline_mode<synchronous>, transform_indices = @transform_7, window_bounds = array<i64: 48, 80>}, {pipeline_mode = #tpu.pipeline_mode<synchronous>, transform_indices = @transform_8, window_bounds = array<i64: 48, 1>}, {transform_indices = @transform_9, window_bounds = array<i64: 1, 96, 8>}]} {
    %c0 = arith.constant 0 : index
    %c0_0 = arith.constant 0 : index
    %c0_1 = arith.constant 0 : index
    %0 = vector.load %arg1[%c0, %c0_0, %c0_1] : memref<1x32x8xf32, #tpu.memory_space<vmem>>, vector<1x32x8xf32>
    %1 = vector.shape_cast %0 : vector<1x32x8xf32> to vector<32x8xf32>
    %c0_2 = arith.constant 0 : index
    %c0_3 = arith.constant 0 : index
    %c0_4 = arith.constant 0 : index
    %2 = vector.load %arg10[%c0_2, %c0_3, %c0_4] : memref<1x96x8xf32, #tpu.memory_space<vmem>>, vector<1x32x8xf32>
    %3 = vector.shape_cast %2 : vector<1x32x8xf32> to vector<32x8xf32>
    %4 = vector.shape_cast %1 : vector<32x8xf32> to vector<1x32x8xf32>
    tpu.vector_store %arg10[%c0_2, %c0_3, %c0_4], %4 {strides = array<i32>} : memref<1x96x8xf32, #tpu.memory_space<vmem>>, vector<1x32x8xf32>,
    %5 = tpu.iota {dimensions = array<i32: 0>} : vector<8x8xi32>
    %6 = tpu.iota {dimensions = array<i32: 1>} : vector<8x8xi32>
    %7 = arith.cmpi sle, %6, %5 : vector<8x8xi32>
    %c0_5 = arith.constant 0 : index
    %c0_6 = arith.constant 0 : index
    %c0_7 = arith.constant 0 : index
    %8 = vector.load %arg10[%c0_5, %c0_6, %c0_7] : memref<1x96x8xf32, #tpu.memory_space<vmem>>, vector<1x32x8xf32>
    %9 = vector.shape_cast %8 : vector<1x32x8xf32> to vector<32x8xf32>
    %10 = arith.truncf %9 : vector<32x8xf32> to vector<32x8xbf16>
    %c0_8 = arith.constant 0 : index
    %c0_9 = arith.constant 0 : index
    %11 = vector.load %arg2[%c0_8, %c0_9] : memref<64x32xbf16, #tpu.memory_space<vmem>>, vector<64x32xbf16>
    %c0_10 = arith.constant 0 : index
    %c0_11 = arith.constant 0 : index
    %12 = vector.load %arg3[%c0_10, %c0_11] : memref<32x1xf32, #tpu.memory_space<vmem>>, vector<32x1xf32>
    %cst = arith.constant dense<0.000000e+00> : vector<64x8xf32>
    %13 = tpu.matmul %11, %10, %cst {dimension_numbers = #tpu.dot_dimension_numbers<[1], [0], [0], [1], [0, 0, 1, 1], [], []>} : vector<64x32xbf16>, vector<32x8xbf16>, vector<64x8xf32> -> vector<64x8xf32>
    %14 = vector.extract_strided_slice %13 {offsets = [0, 0], sizes = [32, 8], strides = [1, 1]} : vector<64x8xf32> to vector<32x8xf32>
    %15 = vector.extract_strided_slice %13 {offsets = [32, 0], sizes = [32, 8], strides = [1, 1]} : vector<64x8xf32> to vector<32x8xf32>
    %cst_12 = arith.constant 0.000000e+00 : f32
    %16 = vector.broadcast %cst_12 : f32 to vector<32x1xf32>
    %17 = vector.extract_strided_slice %15 {offsets = [0, 0], sizes = [32, 7], strides = [1, 1]} : vector<32x8xf32> to vector<32x7xf32>
    %18 = tpu.concatenate %16, %17 in 1 : vector<32x1xf32>, vector<32x7xf32> -> vector<32x8xf32>
    %19 = arith.addf %14, %18 : vector<32x8xf32>
    %20 = vector.broadcast %12 : vector<32x1xf32> to vector<32x8xf32>
    %21 = arith.addf %19, %20 : vector<32x8xf32>
    %22 = vector.extract_strided_slice %21 {offsets = [0, 0], sizes = [16, 8], strides = [1, 1]} : vector<32x8xf32> to vector<16x8xf32>
    %23 = math.tanh %22 : vector<16x8xf32>
    %24 = vector.extract_strided_slice %21 {offsets = [16, 0], sizes = [16, 8], strides = [1, 1]} : vector<32x8xf32> to vector<16x8xf32>
    %25 = arith.negf %24 : vector<16x8xf32>
    %26 = math.exp %25 : vector<16x8xf32>
    %cst_13 = arith.constant 1.000000e+00 : f32
    %27 = vector.broadcast %cst_13 : f32 to vector<16x8xf32>
    %28 = arith.addf %27, %26 : vector<16x8xf32>
    %29 = arith.divf %27, %28 : vector<16x8xf32>
    %30 = arith.mulf %23, %29 : vector<16x8xf32>
    %c0_14 = arith.constant 0 : index
    %c32 = arith.constant 32 : index
    %c0_15 = arith.constant 0 : index
    %31 = vector.load %arg10[%c0_14, %c32, %c0_15] : memref<1x96x8xf32, #tpu.memory_space<vmem>>, vector<1x16x8xf32>
    %32 = vector.shape_cast %31 : vector<1x16x8xf32> to vector<16x8xf32>
    %33 = vector.shape_cast %30 : vector<16x8xf32> to vector<1x16x8xf32>
    tpu.vector_store %arg10[%c0_14, %c32, %c0_15], %33 {strides = array<i32>} : memref<1x96x8xf32, #tpu.memory_space<vmem>>, vector<1x16x8xf32>,
    %c0_16 = arith.constant 0 : index
    %c0_17 = arith.constant 0 : index
    %c0_18 = arith.constant 0 : index
    %34 = vector.load %arg10[%c0_16, %c0_17, %c0_18] : memref<1x96x8xf32, #tpu.memory_space<vmem>>, vector<1x48x8xf32>
    %35 = vector.shape_cast %34 : vector<1x48x8xf32> to vector<48x8xf32>
    %36 = arith.truncf %35 : vector<48x8xf32> to vector<48x8xbf16>
    %c0_19 = arith.constant 0 : index
    %c0_20 = arith.constant 0 : index
    %37 = vector.load %arg4[%c0_19, %c0_20] : memref<64x48xbf16, #tpu.memory_space<vmem>>, vector<64x48xbf16>
    %c0_21 = arith.constant 0 : index
    %c0_22 = arith.constant 0 : index
    %38 = vector.load %arg5[%c0_21, %c0_22] : memref<32x1xf32, #tpu.memory_space<vmem>>, vector<32x1xf32>
    %cst_23 = arith.constant dense<0.000000e+00> : vector<64x8xf32>
    %39 = tpu.matmul %37, %36, %cst_23 {dimension_numbers = #tpu.dot_dimension_numbers<[1], [0], [0], [1], [0, 0, 1, 1], [], []>} : vector<64x48xbf16>, vector<48x8xbf16>, vector<64x8xf32> -> vector<64x8xf32>
    %40 = vector.extract_strided_slice %39 {offsets = [0, 0], sizes = [32, 8], strides = [1, 1]} : vector<64x8xf32> to vector<32x8xf32>
    %41 = vector.extract_strided_slice %39 {offsets = [32, 0], sizes = [32, 8], strides = [1, 1]} : vector<64x8xf32> to vector<32x8xf32>
    %cst_24 = arith.constant 0.000000e+00 : f32
    %42 = vector.broadcast %cst_24 : f32 to vector<32x2xf32>
    %43 = vector.extract_strided_slice %41 {offsets = [0, 0], sizes = [32, 6], strides = [1, 1]} : vector<32x8xf32> to vector<32x6xf32>
    %44 = tpu.concatenate %42, %43 in 1 : vector<32x2xf32>, vector<32x6xf32> -> vector<32x8xf32>
    %45 = arith.addf %40, %44 : vector<32x8xf32>
    %46 = vector.broadcast %38 : vector<32x1xf32> to vector<32x8xf32>
    %47 = arith.addf %45, %46 : vector<32x8xf32>
    %48 = vector.extract_strided_slice %47 {offsets = [0, 0], sizes = [16, 8], strides = [1, 1]} : vector<32x8xf32> to vector<16x8xf32>
    %49 = math.tanh %48 : vector<16x8xf32>
    %50 = vector.extract_strided_slice %47 {offsets = [16, 0], sizes = [16, 8], strides = [1, 1]} : vector<32x8xf32> to vector<16x8xf32>
    %51 = arith.negf %50 : vector<16x8xf32>
    %52 = math.exp %51 : vector<16x8xf32>
    %cst_25 = arith.constant 1.000000e+00 : f32
    %53 = vector.broadcast %cst_25 : f32 to vector<16x8xf32>
    %54 = arith.addf %53, %52 : vector<16x8xf32>
    %55 = arith.divf %53, %54 : vector<16x8xf32>
    %56 = arith.mulf %49, %55 : vector<16x8xf32>
    %c0_26 = arith.constant 0 : index
    %c48 = arith.constant 48 : index
    %c0_27 = arith.constant 0 : index
    %57 = vector.load %arg10[%c0_26, %c48, %c0_27] : memref<1x96x8xf32, #tpu.memory_space<vmem>>, vector<1x16x8xf32>
    %58 = vector.shape_cast %57 : vector<1x16x8xf32> to vector<16x8xf32>
    %59 = vector.shape_cast %56 : vector<16x8xf32> to vector<1x16x8xf32>
    tpu.vector_store %arg10[%c0_26, %c48, %c0_27], %59 {strides = array<i32>} : memref<1x96x8xf32, #tpu.memory_space<vmem>>, vector<1x16x8xf32>,
    %c0_28 = arith.constant 0 : index
    %c0_29 = arith.constant 0 : index
    %c0_30 = arith.constant 0 : index
    %60 = vector.load %arg10[%c0_28, %c0_29, %c0_30] : memref<1x96x8xf32, #tpu.memory_space<vmem>>, vector<1x64x8xf32>
    %61 = vector.shape_cast %60 : vector<1x64x8xf32> to vector<64x8xf32>
    %62 = arith.truncf %61 : vector<64x8xf32> to vector<64x8xbf16>
    %c0_31 = arith.constant 0 : index
    %c0_32 = arith.constant 0 : index
    %63 = vector.load %arg6[%c0_31, %c0_32] : memref<64x64xbf16, #tpu.memory_space<vmem>>, vector<64x64xbf16>
    %c0_33 = arith.constant 0 : index
    %c0_34 = arith.constant 0 : index
    %64 = vector.load %arg7[%c0_33, %c0_34] : memref<32x1xf32, #tpu.memory_space<vmem>>, vector<32x1xf32>
    %cst_35 = arith.constant dense<0.000000e+00> : vector<64x8xf32>
    %65 = tpu.matmul %63, %62, %cst_35 {dimension_numbers = #tpu.dot_dimension_numbers<[1], [0], [0], [1], [0, 0, 1, 1], [], []>} : vector<64x64xbf16>, vector<64x8xbf16>, vector<64x8xf32> -> vector<64x8xf32>
    %66 = vector.extract_strided_slice %65 {offsets = [0, 0], sizes = [32, 8], strides = [1, 1]} : vector<64x8xf32> to vector<32x8xf32>
    %67 = vector.extract_strided_slice %65 {offsets = [32, 0], sizes = [32, 8], strides = [1, 1]} : vector<64x8xf32> to vector<32x8xf32>
    %cst_36 = arith.constant 0.000000e+00 : f32
    %68 = vector.broadcast %cst_36 : f32 to vector<32x4xf32>
    %69 = vector.extract_strided_slice %67 {offsets = [0, 0], sizes = [32, 4], strides = [1, 1]} : vector<32x8xf32> to vector<32x4xf32>
    %70 = tpu.concatenate %68, %69 in 1 : vector<32x4xf32>, vector<32x4xf32> -> vector<32x8xf32>
    %71 = arith.addf %66, %70 : vector<32x8xf32>
    %72 = vector.broadcast %64 : vector<32x1xf32> to vector<32x8xf32>
    %73 = arith.addf %71, %72 : vector<32x8xf32>
    %74 = vector.extract_strided_slice %73 {offsets = [0, 0], sizes = [16, 8], strides = [1, 1]} : vector<32x8xf32> to vector<16x8xf32>
    %75 = math.tanh %74 : vector<16x8xf32>
    %76 = vector.extract_strided_slice %73 {offsets = [16, 0], sizes = [16, 8], strides = [1, 1]} : vector<32x8xf32> to vector<16x8xf32>
    %77 = arith.negf %76 : vector<16x8xf32>
    %78 = math.exp %77 : vector<16x8xf32>
    %cst_37 = arith.constant 1.000000e+00 : f32
    %79 = vector.broadcast %cst_37 : f32 to vector<16x8xf32>
    %80 = arith.addf %79, %78 : vector<16x8xf32>
    %81 = arith.divf %79, %80 : vector<16x8xf32>
    %82 = arith.mulf %75, %81 : vector<16x8xf32>
    %c0_38 = arith.constant 0 : index
    %c64 = arith.constant 64 : index
    %c0_39 = arith.constant 0 : index
    %83 = vector.load %arg10[%c0_38, %c64, %c0_39] : memref<1x96x8xf32, #tpu.memory_space<vmem>>, vector<1x16x8xf32>
    %84 = vector.shape_cast %83 : vector<1x16x8xf32> to vector<16x8xf32>
    %85 = vector.shape_cast %82 : vector<16x8xf32> to vector<1x16x8xf32>
    tpu.vector_store %arg10[%c0_38, %c64, %c0_39], %85 {strides = array<i32>} : memref<1x96x8xf32, #tpu.memory_space<vmem>>, vector<1x16x8xf32>,
    %c0_40 = arith.constant 0 : index
    %c0_41 = arith.constant 0 : index
    %c0_42 = arith.constant 0 : index
    %86 = vector.load %arg10[%c0_40, %c0_41, %c0_42] : memref<1x96x8xf32, #tpu.memory_space<vmem>>, vector<1x80x8xf32>
    %87 = vector.shape_cast %86 : vector<1x80x8xf32> to vector<80x8xf32>
    %88 = arith.truncf %87 : vector<80x8xf32> to vector<80x8xbf16>
    %c0_43 = arith.constant 0 : index
    %c0_44 = arith.constant 0 : index
    %89 = vector.load %arg8[%c0_43, %c0_44] : memref<48x80xbf16, #tpu.memory_space<vmem>>, vector<48x80xbf16>
    %c0_45 = arith.constant 0 : index
    %c0_46 = arith.constant 0 : index
    %90 = vector.load %arg9[%c0_45, %c0_46] : memref<48x1xf32, #tpu.memory_space<vmem>>, vector<48x1xf32>
    %cst_47 = arith.constant dense<0.000000e+00> : vector<48x8xf32>
    %91 = tpu.matmul %89, %88, %cst_47 {dimension_numbers = #tpu.dot_dimension_numbers<[1], [0], [0], [1], [0, 0, 1, 1], [], []>} : vector<48x80xbf16>, vector<80x8xbf16>, vector<48x8xf32> -> vector<48x8xf32>
    %92 = vector.broadcast %90 : vector<48x1xf32> to vector<48x8xf32>
    %93 = arith.addf %91, %92 : vector<48x8xf32>
    %94 = vector.extract_strided_slice %93 {offsets = [0, 0], sizes = [16, 8], strides = [1, 1]} : vector<48x8xf32> to vector<16x8xf32>
    %95 = vector.extract_strided_slice %93 {offsets = [16, 0], sizes = [16, 8], strides = [1, 1]} : vector<48x8xf32> to vector<16x8xf32>
    %96 = vector.extract_strided_slice %93 {offsets = [32, 0], sizes = [16, 8], strides = [1, 1]} : vector<48x8xf32> to vector<16x8xf32>
    %97 = tpu.transpose %94, [1, 0] : vector<16x8xf32> -> vector<8x16xf32>
    %98 = arith.truncf %97 : vector<8x16xf32> to vector<8x16xbf16>
    %99 = arith.truncf %95 : vector<16x8xf32> to vector<16x8xbf16>
    %cst_48 = arith.constant dense<0.000000e+00> : vector<8x8xf32>
    %100 = tpu.matmul %98, %99, %cst_48 {dimension_numbers = #tpu.dot_dimension_numbers<[1], [0], [0], [1], [0, 0, 1, 1], [], []>} : vector<8x16xbf16>, vector<16x8xbf16>, vector<8x8xf32> -> vector<8x8xf32>
    %cst_49 = arith.constant 2.500000e-01 : f32
    %101 = vector.broadcast %cst_49 : f32 to vector<8x8xf32>
    %102 = arith.mulf %100, %101 : vector<8x8xf32>
    %cst_50 = arith.constant -1.000000e+30 : f32
    %103 = vector.broadcast %cst_50 : f32 to vector<8x8xf32>
    %104 = arith.select %7, %102, %103 : vector<8x8xi1>, vector<8x8xf32>
    %cst_51 = arith.constant dense<0xFF800000> : vector<8xf32>
    %105 = vector.multi_reduction <maximumf>, %104, %cst_51 [1] : vector<8x8xf32> to vector<8xf32>
    %106 = vector.shape_cast %105 : vector<8xf32> to vector<8x1xf32>
    %107 = vector.broadcast %106 : vector<8x1xf32> to vector<8x8xf32>
    %108 = arith.subf %104, %107 : vector<8x8xf32>
    %109 = math.exp %108 : vector<8x8xf32>
    %cst_52 = arith.constant dense<0.000000e+00> : vector<8xf32>
    %110 = vector.multi_reduction <add>, %109, %cst_52 [1] : vector<8x8xf32> to vector<8xf32>
    %111 = vector.shape_cast %110 : vector<8xf32> to vector<8x1xf32>
    %112 = tpu.reciprocal %111 : vector<8x1xf32> -> vector<8x1xf32>
    %113 = vector.broadcast %112 : vector<8x1xf32> to vector<8x8xf32>
    %114 = arith.mulf %109, %113 : vector<8x8xf32>
    %115 = arith.truncf %96 : vector<16x8xf32> to vector<16x8xbf16>
    %116 = arith.truncf %114 : vector<8x8xf32> to vector<8x8xbf16>
    %cst_53 = arith.constant dense<0.000000e+00> : vector<16x8xf32>
    %117 = tpu.matmul %115, %116, %cst_53 {dimension_numbers = #tpu.dot_dimension_numbers<[1], [1], [0], [0], [0, 0, 1, 0], [], []>} : vector<16x8xbf16>, vector<8x8xbf16>, vector<16x8xf32> -> vector<16x8xf32>
    %c0_54 = arith.constant 0 : index
    %c80 = arith.constant 80 : index
    %c0_55 = arith.constant 0 : index
    %118 = vector.load %arg10[%c0_54, %c80, %c0_55] : memref<1x96x8xf32, #tpu.memory_space<vmem>>, vector<1x16x8xf32>
    %119 = vector.shape_cast %118 : vector<1x16x8xf32> to vector<16x8xf32>
    %120 = vector.shape_cast %117 : vector<16x8xf32> to vector<1x16x8xf32>
    tpu.vector_store %arg10[%c0_54, %c80, %c0_55], %120 {strides = array<i32>} : memref<1x96x8xf32, #tpu.memory_space<vmem>>, vector<1x16x8xf32>,
    return
  }
  func.func @transform_0(%arg0: i32) -> (i32, i32, i32) {
    %c0_i32 = arith.constant 0 : i32
    %c0_i32_0 = arith.constant 0 : i32
    %c0_i32_1 = arith.constant 0 : i32
    return %arg0, %c0_i32, %c0_i32_0 : i32, i32, i32
  }
  func.func @transform_1(%arg0: i32) -> (i32, i32) {
    %c0_i32 = arith.constant 0 : i32
    %c0_i32_0 = arith.constant 0 : i32
    %c0_i32_1 = arith.constant 0 : i32
    return %c0_i32, %c0_i32_0 : i32, i32
  }
  func.func @transform_2(%arg0: i32) -> (i32, i32) {
    %c0_i32 = arith.constant 0 : i32
    %c0_i32_0 = arith.constant 0 : i32
    %c0_i32_1 = arith.constant 0 : i32
    return %c0_i32, %c0_i32_0 : i32, i32
  }
  func.func @transform_3(%arg0: i32) -> (i32, i32) {
    %c0_i32 = arith.constant 0 : i32
    %c0_i32_0 = arith.constant 0 : i32
    %c0_i32_1 = arith.constant 0 : i32
    return %c0_i32, %c0_i32_0 : i32, i32
  }
  func.func @transform_4(%arg0: i32) -> (i32, i32) {
    %c0_i32 = arith.constant 0 : i32
    %c0_i32_0 = arith.constant 0 : i32
    %c0_i32_1 = arith.constant 0 : i32
    return %c0_i32, %c0_i32_0 : i32, i32
  }
  func.func @transform_5(%arg0: i32) -> (i32, i32) {
    %c0_i32 = arith.constant 0 : i32
    %c0_i32_0 = arith.constant 0 : i32
    %c0_i32_1 = arith.constant 0 : i32
    return %c0_i32, %c0_i32_0 : i32, i32
  }
  func.func @transform_6(%arg0: i32) -> (i32, i32) {
    %c0_i32 = arith.constant 0 : i32
    %c0_i32_0 = arith.constant 0 : i32
    %c0_i32_1 = arith.constant 0 : i32
    return %c0_i32, %c0_i32_0 : i32, i32
  }
  func.func @transform_7(%arg0: i32) -> (i32, i32) {
    %c0_i32 = arith.constant 0 : i32
    %c0_i32_0 = arith.constant 0 : i32
    %c0_i32_1 = arith.constant 0 : i32
    return %c0_i32, %c0_i32_0 : i32, i32
  }
  func.func @transform_8(%arg0: i32) -> (i32, i32) {
    %c0_i32 = arith.constant 0 : i32
    %c0_i32_0 = arith.constant 0 : i32
    %c0_i32_1 = arith.constant 0 : i32
    return %c0_i32, %c0_i32_0 : i32, i32
  }
  func.func @transform_9(%arg0: i32) -> (i32, i32, i32) {
    %c0_i32 = arith.constant 0 : i32
    %c0_i32_0 = arith.constant 0 : i32
    %c0_i32_1 = arith.constant 0 : i32
    return %arg0, %c0_i32, %c0_i32_0 : i32, i32, i32
  }
}

</mosaic_0001>

<bundles_post_ra>
// kernel: tpu_custom_call.1
= control target key start
LH: loop header
LB: loop body
LE: loop exit
PB: predicated region body
PF: predicated region fallthrough
CT: control target
= control target key end

     0   :  { %s1366_s30 = smov 0   ;;  %s1561_s0 = inlined_call_operand.vmem [shape: f32[2,32,8], index: 0, kind: input, shape index: {}]   ;;  %s1562_s1 = inlined_call_operand.vmem [shape: bf16[64,32], index: 1, kind: input, shape index: {}]   ;;  %s1563_s2 = inlined_call_operand.vmem [shape: f32[32,1], index: 2, kind: input, shape index: {}]   ;;  %s1564_s3 = inlined_call_operand.vmem [shape: bf16[64,48], index: 3, kind: input, shape index: {}]   ;;  %s1565_s4 = inlined_call_operand.vmem [shape: f32[32,1], index: 4, kind: input, shape index: {}]   ;;  %s1566_s5 = inlined_call_operand.vmem [shape: bf16[64,64], index: 5, kind: input, shape index: {}]   ;;  %s1567_s6 = inlined_call_operand.vmem [shape: f32[32,1], index: 6, kind: input, shape index: {}]   ;;  %s1568_s7 = inlined_call_operand.vmem [shape: bf16[48,80], index: 7, kind: input, shape index: {}]   ;;  %s1569_s8 = inlined_call_operand.vmem [shape: f32[48,1], index: 8, kind: input, shape index: {}]   ;;  %s1570_s9 = inlined_call_operand.vmem [shape: f32[2,96,8], index: 9, kind: output, shape index: {}]  }
   0x1 LB: > { %s1138_s10 = sadd.s32 4294967295, %s1310_s30   ;;  %p1142_p0 = scmp.ge.s32.totalorder %s1310_s30, 1  ;;  %s1310_s30 = sphi %s1366_s30, %s19_s30  }
   0x2   : > { %p287_p1 = scmp.lt.s32.totalorder %s1310_s30, 3 }
   0x4   : > { %p288_p2 = pnand %p1142_p0, %p287_p1 }
   0x5   : > { %p323_p3 = scmp.lt.s32.totalorder (!%p288_p2), %s1138_s10, 1  ;;  %s1313_s13 = smov (!%p288_p2), 1  }
   0x6   : > { %291 = sbr.rel (%p288_p2) target bundleno = 1945 (0x799), region = 56  ;;  %s1314_s29 = smov (!%p288_p2), 2  }
   0x7   : > { %s1315_s25 = smov (!%p288_p2), 4  }
   0xb   : > { %s1572_s10 = smov (!%p323_p3, %s1138_s10), 1  ;;  %vm338_vm0 = vcmask 64512   ;;  %v1232_v10 = vld [vmem:[%s1562_s1] sm:$0xff]  ;;  %vm386_vm1 = vcmask 261120   ;;  %v1233_v11 = vld [vmem:[%s1562_s1 + $0x8] sm:$0xff]  ;;  %v1234_v12 = vld [vmem:[%s1562_s1 + $0x10] sm:$0xff] }
   0xc   : > { %s1231_s11 = sshll.u32 %s1572_s10, 5  ;;  %s1247_s12 = smul.u32 96, %s1572_s10  ;;  %v1235_v13 = vld [vmem:[%s1562_s1 + $0x18] sm:$0xff]  ;;  %v364_v14 = vld [vmem:[%s1563_s2 + $0x10] sm:$0xff]  ;;  %v1312_v15 = vmov 0   ;;  %v363_v17 = vld [vmem:[%s1563_s2 + $0x8] sm:$0xff] }
   0xd   : > { %s327_s15 = scalar_lea.vmem %s1561_s0, %s1231_s11  ;;  %1261 = vset.pattern.permute.xlu1 %v1312_v15  ;;  %1262 = vset.pattern.permute.xlu0 %v1312_v15  ;;  %v365_v16 = vld [vmem:[%s1563_s2 + $0x18] sm:$0xff]  ;;  %v362_v26 = vld [vmem:[%s1563_s2] sm:$0xff]  ;;  %vm444_vm2 = vcmask 7168   ;;  %vm562_vm11 = vcmask 392192   ;;  %vm620_vm12 = vcmask 15360  }
   0xe   : > { %s1380_s18 = scalar_lea.vmem %s1570_s9, %s1247_s12  ;;  %v336_v0 = vld [vmem:[%s327_s15 + $0x10] sm:$0xff]  ;;  %v337_v1 = vld [vmem:[%s327_s15 + $0x18] sm:$0xff]  ;;  %v334_v2 = vld [vmem:[%s327_s15] sm:$0xff]  ;;  %465 = vperm.xlu1 %1261, %v364_v14   ;;  %1263 = vset.pattern.permute.xlu2 %v1312_v15 }
   0xf   : > { %341 = vst.msk [vmem:[%s1380_s18 + $0x10] sm:$0xff] %vm338_vm0, %v336_v0  ;;  %v335_v3 = vld [vmem:[%s327_s15 + $0x8] sm:$0xff]  ;;  %v541_v27 = vld [vmem:[%s1565_s4 + $0x18] sm:$0xff]  ;;  %v538_v28 = vld [vmem:[%s1565_s4] sm:$0xff] }
  0x10   : > { %342 = vst.msk [vmem:[%s1380_s18 + $0x18] sm:$0xff] %vm338_vm0, %v337_v1 }
  0x11   : > { %339 = vst.msk [vmem:[%s1380_s18] sm:$0xff] %vm338_vm0, %v334_v2 }
  0x12   : > { %340 = vst.msk [vmem:[%s1380_s18 + $0x8] sm:$0xff] %vm338_vm0, %v335_v3 }
  0x16   : > { %v350_v4 = vld [vmem:[%s1380_s18 + $0x10] sm:$0xff]  ;;  %470 = vperm.xlu1 %1261, %v365_v16  }
  0x17   : > { %v351_v5 = vld [vmem:[%s1380_s18 + $0x18] sm:$0xff] }
  0x18   : > { %v1392_v6 = vpack.c.bf16 %v351_v5, %v350_v4  ;;  %v348_v7 = vld [vmem:[%s1380_s18] sm:$0xff] }
  0x19   : > { %v349_v8 = vld [vmem:[%s1380_s18 + $0x8] sm:$0xff] }
  0x1a   : > { %405 = vmatpush.bf16.msra.mxu0 %v1392_v6  ;;  %v1397_v9 = vpack.c.bf16 %v349_v8, %v348_v7 }
  0x1e   : > { %406 = vmatpush.bf16.msra.mxu0 %v1397_v9  ;;  %460 = vperm.xlu1 %1261, %v363_v17  }
  0x21   : > { %1162 = vmatmul.msk.bf16.vlgmr.msra.gmra.mxu0 %vm386_vm1, %v1232_v10 }
  0x31   : > { %1163 = vmatmul.msk.bf16.gmra.mxu0 %vm386_vm1, %v1233_v11 }
  0x41   : > { %1164 = vmatmul.msk.bf16.gmra.mxu0 %vm386_vm1, %v1234_v12 }
  0x51   : > { %1165 = vmatmul.msk.bf16.gmra.mxu0 %vm386_vm1, %v1235_v13 }
  0x80   : > { %v466_v30 = vpop.permute.xlu1 %465 }
  0x88   : > { %v471_v39 = vpop.permute.xlu1 %470 }
  0x90   : > { %v461_v57 = vpop.permute.xlu1 %460 }
  0x9e   : > { %v408_v18 = vpop.f32.mrf.mxu0 }
  0xa6   : > { %v410_v19 = vpop.f32.mrf.mxu0 }
  0xae   : > { %v413_v20 = vpop.f32.mrf.mxu0 }
  0xb6   : > { %v415_v21 = vpop.f32.mrf.mxu0 }
  0xbe   : > { %v418_v22 = vpop.f32.mrf.mxu0 }
  0xbf   : > { %432 = vrot.lane.b32.xlu2 %v418_v22, %s1313_s13  ;;  %v1238_v22 = vld [vmem:[%s1564_s3 + $0x10] sm:$0xff] }
  0xc6   : > { %v420_v23 = vpop.f32.mrf.mxu0 }
  0xc7   : > { %434 = vrot.lane.b32.xlu2 %v420_v23, %s1313_s13  ;;  %v1239_v23 = vld [vmem:[%s1564_s3 + $0x18] sm:$0xff] }
  0xce   : > { %v423_v24 = vpop.f32.mrf.mxu0 }
  0xcf   : > { %436 = vrot.lane.b32.xlu0 %v423_v24, %s1313_s13 }
  0xd6   : > { %v425_v25 = vpop.f32.mrf.mxu0 }
  0xd7   : > { %438 = vrot.lane.b32.xlu0 %v425_v25, %s1313_s13 }
  0xdf   : > { %455 = vperm.xlu0 %1262, %v362_v26  }
  0xe7   : > { %646 = vperm.xlu0 %1262, %v541_v27  }
  0xef   : > { %631 = vperm.xlu0 %1262, %v538_v28  }
 0x119   : > { %v433_v38 = vpop.permute.xlu2 %432 }
 0x11a   : > { %v445_v44 = vsel %vm444_vm2, 0.0, %v433_v38 }
 0x11b   : > { %v449_v46 = vadd.f32 %v445_v44, %v408_v18 }
 0x121   : > { %v435_v47 = vpop.permute.xlu2 %434 }
 0x122   : > { %v446_v52 = vsel %vm444_vm2, 0.0, %v435_v47 }
 0x123   : > { %v450_v55 = vadd.f32 %v446_v52, %v410_v19 }
 0x125   : > { %v474_v62 = vadd.f32 %v461_v57, %v450_v55 }
 0x141   : > { %v437_v29 = vpop.permute.xlu0 %436 }
 0x142   : > { %v447_v31 = vsel %vm444_vm2, 0.0, %v437_v29 }
 0x143   : > { %v451_v32 = vadd.f32 %v447_v31, %v413_v20  ;;  %v1236_v20 = vld [vmem:[%s1564_s3] sm:$0xff]  ;;  %v540_v31 = vld [vmem:[%s1565_s4 + $0x10] sm:$0xff] }
 0x145   : > { %v475_v33 = vadd.f32 %v466_v30, %v451_v32 }
 0x147   : > { %v1166_v34 = vmul.f32 -1.442695, %v475_v33  ;;  %v539_v33 = vld [vmem:[%s1565_s4 + $0x8] sm:$0xff] }
 0x149   : > { %1264 = vpow2.f32 %v1166_v34  ;;  %v439_v35 = vpop.permute.xlu0 %438  ;;  %v719_v34 = vld [vmem:[%s1567_s6 + $0x10] sm:$0xff] }
 0x14a   : > { %v448_v36 = vsel %vm444_vm2, 0.0, %v439_v35 }
 0x14b   : > { %v452_v37 = vadd.f32 %v448_v36, %v415_v21  ;;  %v1237_v21 = vld [vmem:[%s1564_s3 + $0x8] sm:$0xff] }
 0x14d   : > { %v476_v40 = vadd.f32 %v471_v39, %v452_v37 }
 0x14f   : > { %v1265_v41 = vpop.eup %1264  ;;  %v1167_v42 = vmul.f32 -1.442695, %v476_v40 }
 0x150   : > { %v485_v43 = vadd.f32 1.0, %v1265_v41 }
 0x151   : > { %1266 = vpow2.f32 %v1167_v42  ;;  %v456_v45 = vpop.permute.xlu0 %455 }
 0x152   : > { %1268 = vrcp.f32 %v485_v43  ;;  %v473_v51 = vadd.f32 %v456_v45, %v449_v46  ;;  %v498_v56 = vand.u32 2147483648, %v485_v43  ;;  %v496_v59 = vand.u32 2147483647, %v485_v43 }
 0x153   : > { %vm492_vm4 = vweird.f32 %v485_v43 }
 0x154   : > { %v499_v63 = vor.u32 1.1754944e-38, %v498_v56  ;;  %vm497_vm6 = vcmp.eq.f32.partialorder %v496_v59, 8.507059e+37 }
 0x157   : > { %v1267_v48 = vpop.eup %1266 }
 0x158   : > { %v1269_v49 = vpop.eup %1268  ;;  %v486_v50 = vadd.f32 1.0, %v1267_v48 }
 0x159   : > { %v488_v53 = vmul.f32 %v1269_v49, %v485_v43  ;;  %vm493_vm3 = vweird.f32 %v1269_v49  ;;  %v647_v45 = vpop.permute.xlu0 %646 }
 0x15a   : > { %1270 = vrcp.f32 %v486_v50  ;;  %vm494_vm5 = vmor %vm492_vm4, %vm493_vm3  ;;  %v513_v7 = vand.u32 2147483648, %v486_v50  ;;  %v511_v10 = vand.u32 2147483647, %v486_v50  ;;  %vm507_vm8 = vweird.f32 %v486_v50 }
 0x15b   : > { %v489_v54 = vsub.f32 1.0, %v488_v53  ;;  %1272 = vtanh.f32 %v473_v51 }
 0x15c   : > { %1274 = vtanh.f32 %v474_v62  ;;  %v514_v12 = vor.u32 1.1754944e-38, %v513_v7  ;;  %vm512_vm10 = vcmp.eq.f32.partialorder %v511_v10, 8.507059e+37 }
 0x15d   : > { %v490_v58 = vmul.f32 %v1269_v49, %v489_v54 }
 0x15f   : > { %v491_v60 = vadd.f32 %v1269_v49, %v490_v58 }
 0x160   : > { %v1271_v61 = vpop.eup %1270 }
 0x161   : > { %v503_v0 = vmul.f32 %v1271_v61, %v486_v50  ;;  %v495_v1 = vsel %vm494_vm5, %v1269_v49, %v491_v60  ;;  %v1273_v2 = vpop.eup %1272  ;;  %vm508_vm7 = vweird.f32 %v1271_v61  ;;  %v632_v56 = vpop.permute.xlu0 %631 }
 0x162   : > { %v500_v3 = vsel %vm497_vm6, %v499_v63, %v495_v1  ;;  %vm509_vm9 = vmor %vm507_vm8, %vm508_vm7  ;;  %v1275_v14 = vpop.eup %1274  ;;  %vm741_vm6 = vcmask 523264   ;;  %vm799_vm7 = vcmask 31744  }
 0x163   : > { %v504_v4 = vsub.f32 1.0, %v503_v0  ;;  %v517_v5 = vmul.f32 %v1273_v2, %v500_v3 }
 0x165   : > { %v505_v8 = vmul.f32 %v1271_v61, %v504_v4  ;;  %519 = vst.msk [vmem:[%s1380_s18 + $0x20] sm:$0xff] %vm338_vm0, %v517_v5 }
 0x167   : > { %v506_v11 = vadd.f32 %v1271_v61, %v505_v8 }
 0x169   : > { %v510_v13 = vsel %vm509_vm9, %v1271_v61, %v506_v11 }
 0x16a   : > { %v515_v15 = vsel %vm512_vm10, %v514_v12, %v510_v13 }
 0x16b   : > { %v518_v16 = vmul.f32 %v1275_v14, %v515_v15 }
 0x16c   : > { %v525_v17 = vld [vmem:[%s1380_s18 + $0x20] sm:$0xff] }
 0x16d   : > { %520 = vst.msk [vmem:[%s1380_s18 + $0x28] sm:$0xff] %vm338_vm0, %v518_v16 }
 0x174   : > { %v526_v18 = vld [vmem:[%s1380_s18 + $0x28] sm:$0xff] }
 0x175   : > { %v1440_v19 = vpack.c.bf16 %v526_v18, %v525_v17 }
 0x177   : > { %580 = vmatpush.bf16.msra.mxu1 %v1440_v19 }
 0x17b   : > { %581 = vmatpush.bf16.msra.mxu1 %v1392_v6 }
 0x17f   : > { %582 = vmatpush.bf16.msra.mxu1 %v1397_v9 }
 0x182   : > { %1184 = vmatmul.msk.bf16.vlgmr.msra.gmra.mxu1 %vm562_vm11, %v1236_v20 }
 0x192   : > { %1185 = vmatmul.msk.bf16.gmra.mxu1 %vm562_vm11, %v1237_v21 }
 0x1a2   : > { %1186 = vmatmul.msk.bf16.gmra.mxu1 %vm562_vm11, %v1238_v22 }
 0x1b2   : > { %1187 = vmatmul.msk.bf16.gmra.mxu1 %vm562_vm11, %v1239_v23 }
 0x1ff   : > { %v584_v24 = vpop.f32.mrf.mxu1 }
 0x207   : > { %v1457_v25 = vpop.f32.mrf.mxu1 }
 0x20f   : > { %v589_v26 = vpop.f32.mrf.mxu1 }
 0x217   : > { %v591_v27 = vpop.f32.mrf.mxu1 }
 0x21f   : > { %v594_v28 = vpop.f32.mrf.mxu1 }
 0x227   : > { %v596_v29 = vpop.f32.mrf.mxu1 }
 0x22f   : > { %v599_v30 = vpop.f32.mrf.mxu1 }
 0x230   : > { %612 = vrot.lane.b32.xlu2 %v599_v30, %s1314_s29  ;;  %v1243_v30 = vld [vmem:[%s1566_s5 + $0x18] sm:$0xff] }
 0x237   : > { %v601_v32 = vpop.f32.mrf.mxu1 }
 0x238   : > { %641 = vperm.xlu2 %1263, %v540_v31   ;;  %614 = vrot.lane.b32.xlu1 %v601_v32, %s1314_s29 }
 0x240   : > { %610 = vrot.lane.b32.xlu2 %v596_v29, %s1314_s29  ;;  %608 = vrot.lane.b32.xlu1 %v594_v28, %s1314_s29  ;;  %v1241_v28 = vld [vmem:[%s1566_s5 + $0x8] sm:$0xff]  ;;  %v1242_v29 = vld [vmem:[%s1566_s5 + $0x10] sm:$0xff] }
 0x248   : > { %636 = vperm.xlu1 %1261, %v539_v33  }
 0x250   : > { %820 = vperm.xlu1 %1261, %v719_v34  }
 0x28a   : > { %v613_v35 = vpop.permute.xlu2 %612 }
 0x28b   : > { %v623_v36 = vsel %vm620_vm12, 0.0, %v613_v35 }
 0x28c   : > { %v627_v37 = vadd.f32 %v623_v36, %v589_v26 }
 0x292   : > { %v642_v38 = vpop.permute.xlu2 %641 }
 0x293   : > { %v651_v39 = vadd.f32 %v642_v38, %v627_v37  ;;  %v897_v37 = vld [vmem:[%s1569_s8] sm:$0xff] }
 0x295   : > { %v1188_v40 = vmul.f32 -1.442695, %v651_v39  ;;  %v900_v39 = vld [vmem:[%s1569_s8 + $0x18] sm:$0xff] }
 0x297   : > { %1276 = vpow2.f32 %v1188_v40  ;;  %v720_v40 = vld [vmem:[%s1567_s6 + $0x18] sm:$0xff] }
 0x29a   : > { %v611_v61 = vpop.permute.xlu2 %610 }
 0x29b   : > { %v622_v2 = vsel %vm620_vm12, 0.0, %v611_v61 }
 0x29c   : > { %v626_v7 = vadd.f32 %v622_v2, %v1457_v25 }
 0x29d   : > { %v1277_v41 = vpop.eup %1276 }
 0x29e   : > { %v661_v42 = vadd.f32 1.0, %v1277_v41 }
 0x2a0   : > { %1278 = vrcp.f32 %v661_v42  ;;  %v674_v60 = vand.u32 2147483648, %v661_v42  ;;  %vm668_vm14 = vweird.f32 %v661_v42  ;;  %v672_v63 = vand.u32 2147483647, %v661_v42 }
 0x2a2   : > { %v675_v1 = vor.u32 1.1754944e-38, %v674_v60  ;;  %vm673_vm1 = vcmp.eq.f32.partialorder %v672_v63, 8.507059e+37 }
 0x2a6   : > { %v1279_v43 = vpop.eup %1278 }
 0x2a7   : > { %v664_v46 = vmul.f32 %v1279_v43, %v661_v42  ;;  %vm669_vm13 = vweird.f32 %v1279_v43  ;;  %v717_v42 = vld [vmem:[%s1567_s6] sm:$0xff] }
 0x2a8   : > { %vm670_vm15 = vmor %vm668_vm14, %vm669_vm13 }
 0x2a9   : > { %v665_v50 = vsub.f32 1.0, %v664_v46 }
 0x2aa   : > { %v615_v44 = vpop.permute.xlu1 %614 }
 0x2ab   : > { %v624_v47 = vsel %vm620_vm12, 0.0, %v615_v44  ;;  %v666_v53 = vmul.f32 %v1279_v43, %v665_v50  ;;  %v718_v44 = vld [vmem:[%s1567_s6 + $0x8] sm:$0xff] }
 0x2ac   : > { %v628_v48 = vadd.f32 %v624_v47, %v591_v27  ;;  %v1240_v27 = vld [vmem:[%s1566_s5] sm:$0xff] }
 0x2ad   : > { %v667_v58 = vadd.f32 %v1279_v43, %v666_v53 }
 0x2ae   : > { %v652_v49 = vadd.f32 %v647_v45, %v628_v48  ;;  %v899_v45 = vld [vmem:[%s1569_s8 + $0x10] sm:$0xff] }
 0x2af   : > { %v671_v0 = vsel %vm670_vm15, %v1279_v43, %v667_v58  ;;  %v898_v43 = vld [vmem:[%s1569_s8 + $0x8] sm:$0xff] }
 0x2b0   : > { %v1189_v51 = vmul.f32 -1.442695, %v652_v49  ;;  %v676_v4 = vsel %vm673_vm1, %v675_v1, %v671_v0  ;;  %vm948_vm1 = vcmask 654336  }
 0x2b2   : > { %1280 = vpow2.f32 %v1189_v51  ;;  %v609_v52 = vpop.permute.xlu1 %608 }
 0x2b3   : > { %v621_v54 = vsel %vm620_vm12, 0.0, %v609_v52 }
 0x2b4   : > { %v625_v55 = vadd.f32 %v621_v54, %v584_v24 }
 0x2b6   : > { %v649_v57 = vadd.f32 %v632_v56, %v625_v55 }
 0x2b8   : > { %v1281_v59 = vpop.eup %1280  ;;  %1282 = vtanh.f32 %v649_v57 }
 0x2b9   : > { %v662_v62 = vadd.f32 1.0, %v1281_v59 }
 0x2ba   : > { %v637_v5 = vpop.permute.xlu1 %636 }
 0x2bb   : > { %1284 = vrcp.f32 %v662_v62  ;;  %v650_v11 = vadd.f32 %v637_v5, %v626_v7  ;;  %v689_v14 = vand.u32 2147483648, %v662_v62  ;;  %v687_v16 = vand.u32 2147483647, %v662_v62 }
 0x2bc   : > { %vm683_vm3 = vweird.f32 %v662_v62 }
 0x2bd   : > { %1286 = vtanh.f32 %v650_v11  ;;  %v690_v18 = vor.u32 1.1754944e-38, %v689_v14  ;;  %vm688_vm5 = vcmp.eq.f32.partialorder %v687_v16, 8.507059e+37 }
 0x2be   : > { %v1283_v3 = vpop.eup %1282 }
 0x2bf   : > { %v693_v8 = vmul.f32 %v1283_v3, %v676_v4 }
 0x2c1   : > { %v1285_v10 = vpop.eup %1284  ;;  %695 = vst.msk [vmem:[%s1380_s18 + $0x30] sm:$0xff] %vm338_vm0, %v693_v8 }
 0x2c2   : > { %v679_v12 = vmul.f32 %v1285_v10, %v662_v62  ;;  %vm684_vm2 = vweird.f32 %v1285_v10  ;;  %v821_v49 = vpop.permute.xlu1 %820 }
 0x2c3   : > { %vm685_vm4 = vmor %vm683_vm3, %vm684_vm2  ;;  %v1287_v21 = vpop.eup %1286  ;;  %vm1016_vm2 = vcmask 130048  }
 0x2c4   : > { %v680_v13 = vsub.f32 1.0, %v679_v12 }
 0x2c6   : > { %v681_v15 = vmul.f32 %v1285_v10, %v680_v13 }
 0x2c8   : > { %v682_v17 = vadd.f32 %v1285_v10, %v681_v15  ;;  %v703_v24 = vld [vmem:[%s1380_s18 + $0x30] sm:$0xff] }
 0x2ca   : > { %v686_v20 = vsel %vm685_vm4, %v1285_v10, %v682_v17 }
 0x2cb   : > { %v691_v22 = vsel %vm688_vm5, %v690_v18, %v686_v20 }
 0x2cc   : > { %v694_v23 = vmul.f32 %v1287_v21, %v691_v22 }
 0x2ce   : > { %696 = vst.msk [vmem:[%s1380_s18 + $0x38] sm:$0xff] %vm338_vm0, %v694_v23 }
 0x2d5   : > { %v704_v25 = vld [vmem:[%s1380_s18 + $0x38] sm:$0xff] }
 0x2d6   : > { %v1479_v26 = vpack.c.bf16 %v704_v25, %v703_v24 }
 0x2d8   : > { %758 = vmatpush.bf16.msra.mxu2 %v1479_v26 }
 0x2dc   : > { %759 = vmatpush.bf16.msra.mxu2 %v1440_v19 }
 0x2e0   : > { %760 = vmatpush.bf16.msra.mxu2 %v1392_v6 }
 0x2e4   : > { %761 = vmatpush.bf16.msra.mxu2 %v1397_v9 }
 0x2e7   : > { %1206 = vmatmul.msk.bf16.vlgmr.msra.gmra.mxu2 %vm741_vm6, %v1240_v27 }
 0x2f7   : > { %1207 = vmatmul.msk.bf16.gmra.mxu2 %vm741_vm6, %v1241_v28 }
 0x307   : > { %1208 = vmatmul.msk.bf16.gmra.mxu2 %vm741_vm6, %v1242_v29 }
 0x317   : > { %1209 = vmatmul.msk.bf16.gmra.mxu2 %vm741_vm6, %v1243_v30 }
 0x36a   : > { %v763_v31 = vpop.f32.mrf.mxu2 }
 0x372   : > { %v1497_v32 = vpop.f32.mrf.mxu2 }
 0x37a   : > { %v768_v33 = vpop.f32.mrf.mxu2 }
 0x382   : > { %v770_v34 = vpop.f32.mrf.mxu2 }
 0x38a   : > { %v773_v35 = vpop.f32.mrf.mxu2 }
 0x392   : > { %v775_v36 = vpop.f32.mrf.mxu2 }
 0x393   : > { %789 = vrot.lane.b32.xlu1 %v775_v36, %s1315_s25 }
 0x39a   : > { %v778_v38 = vpop.f32.mrf.mxu2 }
 0x39b   : > { %905 = vperm.xlu1 %1261, %v897_v37   ;;  %791 = vrot.lane.b32.xlu2 %v778_v38, %s1315_s25 }
 0x3a2   : > { %v780_v41 = vpop.f32.mrf.mxu2 }
 0x3a3   : > { %920 = vperm.xlu1 %1261, %v900_v39   ;;  %825 = vperm.xlu2 %1263, %v720_v40   ;;  %v1244_v39 = vld [vmem:[%s1568_s7] sm:$0xff]  ;;  %v1245_v40 = vld [vmem:[%s1568_s7 + $0x8] sm:$0xff] }
 0x3a4   : > { %793 = vrot.lane.b32.xlu0 %v780_v41, %s1315_s25 }
 0x3ab   : > { %810 = vperm.xlu2 %1263, %v717_v42  }
 0x3ac   : > { %787 = vrot.lane.b32.xlu0 %v773_v35, %s1315_s25 }
 0x3b3   : > { %910 = vperm.xlu2 %1263, %v898_v43  }
 0x3b4   : > { %815 = vperm.xlu0 %1262, %v718_v44  }
 0x3bc   : > { %915 = vperm.xlu0 %1262, %v899_v45  }
 0x3f5   : > { %v792_v46 = vpop.permute.xlu2 %791 }
 0x3f6   : > { %v802_v47 = vsel %vm799_vm7, 0.0, %v792_v46 }
 0x3f7   : > { %v806_v48 = vadd.f32 %v802_v47, %v768_v33 }
 0x3f9   : > { %v830_v50 = vadd.f32 %v821_v49, %v806_v48 }
 0x3fb   : > { %v1210_v51 = vmul.f32 -1.442695, %v830_v50 }
 0x3fd   : > { %1288 = vpow2.f32 %v1210_v51  ;;  %v826_v57 = vpop.permute.xlu2 %825  ;;  %v901_v51 = vld [vmem:[%s1569_s8 + $0x20] sm:$0xff] }
 0x403   : > { %v1289_v52 = vpop.eup %1288 }
 0x404   : > { %v840_v53 = vadd.f32 1.0, %v1289_v52 }
 0x405   : > { %v811_v3 = vpop.permute.xlu2 %810  ;;  %v790_v10 = vpop.permute.xlu1 %789 }
 0x406   : > { %1290 = vrcp.f32 %v840_v53  ;;  %v853_v8 = vand.u32 2147483648, %v840_v53  ;;  %vm847_vm9 = vweird.f32 %v840_v53  ;;  %v851_v12 = vand.u32 2147483647, %v840_v53 }
 0x407   : > { %v801_v14 = vsel %vm799_vm7, 0.0, %v790_v10 }
 0x408   : > { %v854_v15 = vor.u32 1.1754944e-38, %v853_v8  ;;  %vm852_vm11 = vcmp.eq.f32.partialorder %v851_v12, 8.507059e+37  ;;  %v805_v20 = vadd.f32 %v801_v14, %v1497_v32 }
 0x40c   : > { %v1291_v54 = vpop.eup %1290 }
 0x40d   : > { %v843_v56 = vmul.f32 %v1291_v54, %v840_v53  ;;  %vm848_vm8 = vweird.f32 %v1291_v54  ;;  %v911_v42 = vpop.permute.xlu2 %910 }
 0x40e   : > { %vm849_vm10 = vmor %vm847_vm9, %vm848_vm8 }
 0x40f   : > { %v844_v61 = vsub.f32 1.0, %v843_v56  ;;  %v343_v56 = vlaneseq }
 0x411   : > { %v845_v0 = vmul.f32 %v1291_v54, %v844_v61 }
 0x413   : > { %v846_v5 = vadd.f32 %v1291_v54, %v845_v0  ;;  %v902_v0 = vld [vmem:[%s1569_s8 + $0x28] sm:$0xff] }
 0x415   : > { %v850_v13 = vsel %vm849_vm10, %v1291_v54, %v846_v5 }
 0x416   : > { %v794_v55 = vpop.permute.xlu0 %793  ;;  %v855_v17 = vsel %vm852_vm11, %v854_v15, %v850_v13 }
 0x417   : > { %v803_v58 = vsel %vm799_vm7, 0.0, %v794_v55 }
 0x418   : > { %v807_v59 = vadd.f32 %v803_v58, %v770_v34  ;;  %v346_v58 = vand.u32 127, %v343_v56 }
 0x41a   : > { %v831_v60 = vadd.f32 %v826_v57, %v807_v59  ;;  %v344_v57 = vshrl.u32 %v343_v56, 7 }
 0x41c   : > { %v1211_v62 = vmul.f32 -1.442695, %v831_v60  ;;  %vm347_vm3 = vcmp.le.s32.totalorder %v346_v58, %v344_v57 }
 0x41e   : > { %1292 = vpow2.f32 %v1211_v62  ;;  %v788_v63 = vpop.permute.xlu0 %787 }
 0x41f   : > { %v800_v1 = vsel %vm799_vm7, 0.0, %v788_v63 }
 0x420   : > { %v804_v2 = vadd.f32 %v800_v1, %v763_v31 }
 0x422   : > { %v828_v4 = vadd.f32 %v811_v3, %v804_v2 }
 0x424   : > { %v1293_v7 = vpop.eup %1292  ;;  %1294 = vtanh.f32 %v828_v4 }
 0x425   : > { %v841_v11 = vadd.f32 1.0, %v1293_v7 }
 0x426   : > { %v816_v18 = vpop.permute.xlu0 %815 }
 0x427   : > { %1296 = vrcp.f32 %v841_v11  ;;  %v829_v23 = vadd.f32 %v816_v18, %v805_v20  ;;  %v868_v27 = vand.u32 2147483648, %v841_v11  ;;  %v866_v29 = vand.u32 2147483647, %v841_v11 }
 0x428   : > { %vm862_vm13 = vweird.f32 %v841_v11 }
 0x429   : > { %1298 = vtanh.f32 %v829_v23  ;;  %v869_v31 = vor.u32 1.1754944e-38, %v868_v27  ;;  %vm867_vm15 = vcmp.eq.f32.partialorder %v866_v29, 8.507059e+37 }
 0x42a   : > { %v1295_v16 = vpop.eup %1294 }
 0x42b   : > { %v872_v21 = vmul.f32 %v1295_v16, %v855_v17 }
 0x42d   : > { %v1297_v22 = vpop.eup %1296  ;;  %874 = vst.msk [vmem:[%s1380_s18 + $0x40] sm:$0xff] %vm338_vm0, %v872_v21 }
 0x42e   : > { %v858_v24 = vmul.f32 %v1297_v22, %v841_v11  ;;  %vm863_vm12 = vweird.f32 %v1297_v22  ;;  %v916_v46 = vpop.permute.xlu0 %915 }
 0x42f   : > { %vm864_vm14 = vmor %vm862_vm13, %vm863_vm12  ;;  %v1299_v33 = vpop.eup %1298 }
 0x430   : > { %v859_v25 = vsub.f32 1.0, %v858_v24 }
 0x432   : > { %v860_v28 = vmul.f32 %v1297_v22, %v859_v25 }
 0x434   : > { %v861_v30 = vadd.f32 %v1297_v22, %v860_v28  ;;  %v884_v36 = vld [vmem:[%s1380_s18 + $0x40] sm:$0xff] }
 0x436   : > { %v865_v32 = vsel %vm864_vm14, %v1297_v22, %v861_v30 }
 0x437   : > { %v870_v34 = vsel %vm867_vm15, %v869_v31, %v865_v32 }
 0x438   : > { %v873_v35 = vmul.f32 %v1299_v33, %v870_v34 }
 0x43a   : > { %875 = vst.msk [vmem:[%s1380_s18 + $0x48] sm:$0xff] %vm338_vm0, %v873_v35 }
 0x441   : > { %v885_v37 = vld [vmem:[%s1380_s18 + $0x48] sm:$0xff] }
 0x442   : > { %v890_v38 = vpack.c.bf16 %v885_v37, %v884_v36 }
 0x444   : > { %961 = vmatpush.bf16.msra.mxu3 %v890_v38 }
 0x448   : > { %962 = vmatpush.bf16.msra.mxu3 %v1479_v26  ;;  %v1246_v26 = vld [vmem:[%s1568_s7 + $0x10] sm:$0xff] }
 0x44c   : > { %963 = vmatpush.bf16.msra.mxu3 %v1440_v19  ;;  %v906_v19 = vpop.permute.xlu1 %905 }
 0x450   : > { %964 = vmatpush.bf16.msra.mxu3 %v1392_v6 }
 0x454   : > { %965 = vmatpush.bf16.msra.mxu3 %v1397_v9  ;;  %v921_v45 = vpop.permute.xlu1 %920 }
 0x457   : > { %1224 = vmatmul.msk.bf16.vlgmr.msra.gmra.mxu3 %vm948_vm1, %v1244_v39 }
 0x467   : > { %1225 = vmatmul.msk.bf16.gmra.mxu3 %vm948_vm1, %v1245_v40 }
 0x477   : > { %1226 = vmatmul.msk.bf16.gmra.mxu3 %vm948_vm1, %v1246_v26 }
 0x4da   : > { %v967_v6 = vpop.f32.mrf.mxu3 }
 0x4db   : > { %v968_v41 = vadd.f32 %v967_v6, %v906_v19 }
 0x4dd   : > { %982 = vxpose.xlu2.b32.start [1/2] (short) (narrow) %v968_v41, 8 }
 0x4e2   : > { %v969_v43 = vpop.f32.mrf.mxu3 }
 0x4e3   : > { %v970_v44 = vadd.f32 %v969_v43, %v911_v42 }
 0x4e5   : > { %983 = vxpose.xlu2.b32.end [2/2] (short) (narrow) %v970_v44, 8 }
 0x4ea   : > { %v972_v9 = vpop.f32.mrf.mxu3 }
 0x4eb   : > { %v973_v48 = vadd.f32 %v972_v9, %v916_v46 }
 0x4f2   : > { %v974_v47 = vpop.f32.mrf.mxu3 }
 0x4f3   : > { %v975_v49 = vadd.f32 %v974_v47, %v921_v45 }
 0x4f5   : > { %v1015_v50 = vpack.c.bf16 %v975_v49, %v973_v48 }
 0x4f7   : > { %1027 = vmatpush.bf16.msrb.mxu3 %v1015_v50 }
 0x4fa   : > { %v977_v54 = vpop.f32.mrf.mxu3 }
 0x502   : > { %v979_v55 = vpop.f32.mrf.mxu3 }
 0x54e   : > { %925 = vperm.xlu2 %1263, %v901_v51  }
 0x576   : > { %v998_v52 = vpop.trf.xlu2 }
 0x577   : > { %v1014_v53 = vpack.c.bf16 %v998_v52, %v998_v52 }
 0x579   : > { %1227 = vmatmul.msk.bf16.vlgmr.msrb.gmra.mxu3 %vm1016_vm2, %v1014_v53 }
 0x5a8   : > { %v926_v24 = vpop.permute.xlu2 %925 }
 0x5a9   : > { %v978_v27 = vadd.f32 %v977_v54, %v926_v24 }
 0x5fc   : > { %v1029_v59 = vpop.f32.mrf.mxu3 }
 0x5fd   : > { %v1033_v60 = vmul.f32 0.25, %v1029_v59 }
 0x5ff   : > { %v1034_v61 = vsel %vm347_vm3, %v1033_v60, -1e+30 }
 0x600   : > { %v1035_v62 = vsel %vm338_vm0, %v1034_v61, -inf }
 0x601   : > { %1036 = vmax.xlane.f32.xlu0 %v1035_v62 }
 0x604   : > { %v1031_v63 = vpop.f32.mrf.mxu3 }
 0x615   : > { %930 = vperm.xlu0 %1262, %v902_v0  }
 0x674   : > { %v1037_v1 = vpop.xlane.xlu0 %1036 }
 0x675   : > { %v1038_v2 = vsub.f32 %v1034_v61, %v1037_v1 }
 0x677   : > { %v1039_v3 = vmul.f32 1.442695, %v1038_v2 }
 0x679   : > { %1300 = vpow2.f32 %v1039_v3 }
 0x67f   : > { %v1301_v4 = vpop.eup %1300 }
 0x680   : > { %v1041_v5 = vsel %vm338_vm0, %v1301_v4, 0.0 }
 0x681   : > { %1042 = vadd.xlane.f32.xlu1 %v1041_v5 }
 0x687   : > { %v931_v22 = vpop.permute.xlu0 %930 }
 0x688   : > { %v980_v25 = vadd.f32 %v979_v55, %v931_v22 }
 0x68a   : > { %v1059_v28 = vpack.c.bf16 %v980_v25, %v978_v27 }
 0x6f4   : > { %v1043_v7 = vpop.xlane.xlu1 %1042 }
 0x6f5   : > { %1302 = vrcp.f32 %v1043_v7  ;;  %v1055_v12 = vand.u32 2147483648, %v1043_v7  ;;  %v1053_v14 = vand.u32 2147483647, %v1043_v7  ;;  %vm1049_vm5 = vweird.f32 %v1043_v7 }
 0x6f7   : > { %v1056_v16 = vor.u32 1.1754944e-38, %v1055_v12  ;;  %vm1054_vm7 = vcmp.eq.f32.partialorder %v1053_v14, 8.507059e+37 }
 0x6fb   : > { %v1303_v8 = vpop.eup %1302 }
 0x6fc   : > { %v1045_v10 = vmul.f32 %v1303_v8, %v1043_v7  ;;  %vm1050_vm4 = vweird.f32 %v1303_v8 }
 0x6fd   : > { %vm1051_vm6 = vmor %vm1049_vm5, %vm1050_vm4 }
 0x6fe   : > { %v1046_v11 = vsub.f32 1.0, %v1045_v10 }
 0x700   : > { %v1047_v13 = vmul.f32 %v1303_v8, %v1046_v11 }
 0x702   : > { %v1048_v15 = vadd.f32 %v1303_v8, %v1047_v13 }
 0x704   : > { %v1052_v17 = vsel %vm1051_vm6, %v1303_v8, %v1048_v15 }
 0x705   : > { %v1057_v18 = vsel %vm1054_vm7, %v1056_v16, %v1052_v17 }
 0x706   : > { %v1058_v20 = vmul.f32 %v1301_v4, %v1057_v18 }
 0x708   : > { %v1060_v21 = vpack.c.bf16 %v1058_v20, %v1058_v20 }
 0x70a   : > { %v1065_v23 = vsel %vm338_vm0, %v1060_v21, 0 }
 0x70b   : > { %1074 = vmatpush.bf16.xpose.msrb.mxu0 %v1065_v23 }
 0x712   : > { %1228 = vmatmul.msk.bf16.vlgmr.msrb.gmra.mxu0 %vm338_vm0, %v1059_v28 }
 0x78f   : > { %v1076_v29 = vpop.f32.mrf.mxu0 }
 0x790   : > { %1081 = vst.msk [vmem:[%s1380_s18 + $0x50] sm:$0xff] %vm338_vm0, %v1076_v29 }
 0x797   : > { %v1078_v30 = vpop.f32.mrf.mxu0 }
 0x798   : > { %1082 = vst.msk [vmem:[%s1380_s18 + $0x58] sm:$0xff] %vm338_vm0, %v1078_v30 }
 0x799 PF: > { %s19_s30 = sadd.s32 1, %s1310_s30  }
 0x79a   : > { %p16_p4 = scmp.ge.s32.totalorder %s19_s30, 4  }
 0x79c   :  { %18 = sbr.rel (!%p16_p4) target bundleno = 1 (0x1), region = 86 }

</bundles_post_ra>
